<compile_context>
chip_gen: v7x
topology: tpu7x:2x2x1
jax: 0.10.0
libtpu: 0.0.40
codegen_flags: <defaults>
</compile_context>

<pallas_src>
import jax
import jax.numpy as jnp
from jax.experimental import pallas as pl
from jax.experimental.pallas import tpu as pltpu


def lstm_kernel(x_ref, h0_ref, c0_ref, w_ih_ref, w_hh_ref, b_ref,
                w_out_ref, b_out_ref,
                y_ref, hn_ref, cn_ref):
    B, H = h0_ref.shape
    T = y_ref.shape[1]

    # One batched MXU pass: input projection for ALL timesteps, bias folded in.
    # x_ref is batch-major (B*T, Fpad); the reshape to (B, T, 4H) only splits
    # the sublane-major leading dim, so it is layout-free.
    x_proj = (jnp.dot(x_ref[...], w_ih_ref[...],
                      preferred_element_type=jnp.float32)
              + b_ref[...])                                  # (B*T, 4H)
    x_proj = x_proj.reshape(B, T, 4 * H)                     # (B, T, 4H)

    # Hoisted loads (JAX does not CSE per-iteration loads/broadcasts).
    w_hh = w_hh_ref[...]                                     # (H, 4H)
    w_row = w_out_ref[...]                                   # (1, H)
    h = h0_ref[...]                                          # (B, H)
    c = c0_ref[...]                                          # (B, H)

    # Statically unrolled recurrence; the only per-step MXU work is h @ W_hh^T.
    # TODO(synk): hold W_hh in the MXU weight registers across the T steps via
    # pltpu.matmul_push_rhs / matmul_acc_lhs / matmul_pop to shave the RHS
    # reload off the serial critical path (kept as jnp.dot for portability).
    hs = []
    for t in range(T):
        gates = x_proj[:, t, :] + jnp.dot(h, w_hh,
                                          preferred_element_type=jnp.float32)
        # PyTorch gate order: i, f, g, o.  One sigmoid pass over the full
        # lane-aligned (B, 4H) vector (3 of 4 quarters used); tanh only on g.
        sig = jax.nn.sigmoid(gates)
        i_g = sig[:, 0:H]
        f_g = sig[:, H:2 * H]
        g_g = jnp.tanh(gates[:, 2 * H:3 * H])
        o_g = sig[:, 3 * H:4 * H]
        c = f_g * c + i_g * g_g
        h = o_g * jnp.tanh(c)
        hs.append(h)                                         # vreg-resident

    hn_ref[...] = h
    cn_ref[...] = c

    # Linear(hidden, 1) head: N=1, so a broadcast multiply + lane reduction
    # (VPU/XLU) over the vreg-resident hidden stack beats T tiny MXU passes.
    # Single lane-dense (B, T) store; no VMEM scratch round trip.
    h_all = jnp.stack(hs, axis=1)                            # (B, T, H)
    y = jnp.sum(h_all * w_row, axis=-1)                      # (B, T)
    y_ref[...] = y + b_out_ref[...]


@jax.jit
def lstm_forward(x, h0, c0, w_ih, w_hh, b_ih, b_hh, w_out, b_out):
    """x: (B, T, F).  Returns (y (B,T,1), (h_n (1,B,H), c_n (1,B,H)))."""
    x = x.astype(jnp.float32)
    B, T, F = x.shape
    H = h0.shape[-1]
    F_pad = -(-F // 8) * 8                                    # 15 -> 16

    # Batch-major, layout-free flatten (no transpose); zero-pad F for an
    # 8-aligned contraction.  All of this fuses into the jitted prologue.
    x_flat = jnp.pad(x.reshape(B * T, F), ((0, 0), (0, F_pad - F)))
    w_ih_t = jnp.pad(w_ih.T.astype(jnp.float32),
                     ((0, F_pad - F), (0, 0)))                # (F_pad, 4H)
    w_hh_t = w_hh.T.astype(jnp.float32)                       # (H, 4H)
    b = (b_ih + b_hh).reshape(1, 4 * H).astype(jnp.float32)   # (1, 4H)
    h0_2d = h0.reshape(B, H).astype(jnp.float32)
    c0_2d = c0.reshape(B, H).astype(jnp.float32)
    w_out_row = w_out.reshape(1, H).astype(jnp.float32)       # (1, H)
    b_out_2d = b_out.reshape(1, 1).astype(jnp.float32)        # (1, 1)

    vmem = pl.BlockSpec(memory_space=pltpu.MemorySpace.VMEM)

    y_bt, h_n, c_n = pl.pallas_call(
        lstm_kernel,
        out_shape=(
            jax.ShapeDtypeStruct((B, T), jnp.float32),
            jax.ShapeDtypeStruct((B, H), jnp.float32),
            jax.ShapeDtypeStruct((B, H), jnp.float32),
        ),
        in_specs=[vmem] * 8,
        out_specs=(vmem, vmem, vmem),
    )(x_flat, h0_2d, c0_2d, w_ih_t, w_hh_t, b, w_out_row, b_out_2d)

    # TODO(synk): for large B, add a leading "parallel" batch grid axis (split
    # on B, not T) to use the second v7x TensorCore; for large T*B, tile the
    # input projection over time chunks (v7x VMEM is half of v5e/v6e).
    y = y_bt[:, :, None]                                      # (B, T, 1)
    return y, (h_n.reshape(1, B, H), c_n.reshape(1, B, H))


def lstm_reference(x, h0, c0, w_ih, w_hh, b_ih, b_hh, w_out, b_out):
    """Pure-JAX reference (matches torch.nn.LSTM semantics, num_layers=1)."""
    B, T, F = x.shape
    H = h0.shape[-1]

    def step(carry, x_t):
        h, c = carry
        gates = x_t @ w_ih.T + h @ w_hh.T + b_ih + b_hh
        i = jax.nn.sigmoid(gates[:, 0:H])
        f = jax.nn.sigmoid(gates[:, H:2 * H])
        g = jnp.tanh(gates[:, 2 * H:3 * H])
        o = jax.nn.sigmoid(gates[:, 3 * H:4 * H])
        c = f * c + i * g
        h = o * jnp.tanh(c)
        return (h, c), h

    (h_n, c_n), hs = jax.lax.scan(step, (h0.reshape(B, H), c0.reshape(B, H)),
                                  jnp.transpose(x, (1, 0, 2)))
    y = jnp.einsum('tbh,oh->bto', hs, w_out) + b_out
    return y, (h_n[None], c_n[None])


if __name__ == "__main__":
    # Small shapes consistent with the module: input_size = n_total_feats = 15.
    B, T, F, H = 2, 8, 15, 32

    key = jax.random.PRNGKey(0)
    ks = jax.random.split(key, 9)

    # nn.LSTM default init: uniform(-1/sqrt(H), 1/sqrt(H)); Linear likewise.
    bound = 1.0 / jnp.sqrt(jnp.float32(H))
    w_ih = jax.random.uniform(ks[0], (4 * H, F), jnp.float32, -bound, bound)
    w_hh = jax.random.uniform(ks[1], (4 * H, H), jnp.float32, -bound, bound)
    b_ih = jax.random.uniform(ks[2], (4 * H,), jnp.float32, -bound, bound)
    b_hh = jax.random.uniform(ks[3], (4 * H,), jnp.float32, -bound, bound)
    w_out = jax.random.uniform(ks[4], (1, H), jnp.float32, -bound, bound)
    b_out = jax.random.uniform(ks[5], (1,), jnp.float32, -bound, bound)

    # init_hidden(): xavier_normal_ on (num_layers, B, H).
    xav_std = jnp.sqrt(2.0 / (B * H + H)).astype(jnp.float32)
    h0 = jax.random.normal(ks[6], (1, B, H), jnp.float32) * xav_std
    c0 = jax.random.normal(ks[7], (1, B, H), jnp.float32) * xav_std

    x = jax.random.normal(ks[8], (B, T, F), jnp.float32)

    y, (h_n, c_n) = lstm_forward(x, h0, c0, w_ih, w_hh, b_ih, b_hh, w_out, b_out)
    jax.block_until_ready((y, h_n, c_n))

    y_ref, (h_ref, c_ref) = lstm_reference(x, h0, c0, w_ih, w_hh, b_ih, b_hh,
                                           w_out, b_out)
    assert y.shape == (B, T, 1) and h_n.shape == (1, B, H) and c_n.shape == (1, B, H)
    assert jnp.allclose(y, y_ref, atol=1e-5, rtol=1e-5)
    assert jnp.allclose(h_n, h_ref, atol=1e-5, rtol=1e-5)
    assert jnp.allclose(c_n, c_ref, atol=1e-5, rtol=1e-5)

    print("KERNEL_OK")
</pallas_src>

<mosaic_0001>
module attributes {stable_mosaic.version = 11 : i64} {
  func.func @lstm_kernel(%arg0: memref<16x16xf32, #tpu.memory_space<vmem>>, %arg1: memref<2x32xf32, #tpu.memory_space<vmem>>, %arg2: memref<2x32xf32, #tpu.memory_space<vmem>>, %arg3: memref<16x128xf32, #tpu.memory_space<vmem>>, %arg4: memref<32x128xf32, #tpu.memory_space<vmem>>, %arg5: memref<1x128xf32, #tpu.memory_space<vmem>>, %arg6: memref<1x32xf32, #tpu.memory_space<vmem>>, %arg7: memref<1x1xf32, #tpu.memory_space<vmem>>, %arg8: memref<2x8xf32, #tpu.memory_space<vmem>>, %arg9: memref<2x32xf32, #tpu.memory_space<vmem>>, %arg10: memref<2x32xf32, #tpu.memory_space<vmem>>) attributes {dimension_semantics = [], scalar_prefetch = 0 : i64, scratch_operands = 0 : i64, tpu.core_type = #tpu.core_type<tc>} {
    %c0 = arith.constant 0 : index
    %c0_0 = arith.constant 0 : index
    %0 = vector.load %arg0[%c0, %c0_0] : memref<16x16xf32, #tpu.memory_space<vmem>>, vector<16x16xf32>
    %c0_1 = arith.constant 0 : index
    %c0_2 = arith.constant 0 : index
    %1 = vector.load %arg3[%c0_1, %c0_2] : memref<16x128xf32, #tpu.memory_space<vmem>>, vector<16x128xf32>
    %cst = arith.constant dense<0.000000e+00> : vector<16x128xf32>
    %2 = tpu.matmul %0, %1, %cst {dimension_numbers = #tpu.dot_dimension_numbers<[1], [0], [0], [1], [0, 0, 1, 1], [], []>} : vector<16x16xf32>, vector<16x128xf32>, vector<16x128xf32> -> vector<16x128xf32>
    %c0_3 = arith.constant 0 : index
    %c0_4 = arith.constant 0 : index
    %3 = vector.load %arg5[%c0_3, %c0_4] : memref<1x128xf32, #tpu.memory_space<vmem>>, vector<1x128xf32>
    %4 = vector.broadcast %3 : vector<1x128xf32> to vector<16x128xf32>
    %5 = arith.addf %2, %4 : vector<16x128xf32>
    %6 = vector.shape_cast %5 : vector<16x128xf32> to vector<2x8x128xf32>
    %c0_5 = arith.constant 0 : index
    %c0_6 = arith.constant 0 : index
    %7 = vector.load %arg4[%c0_5, %c0_6] : memref<32x128xf32, #tpu.memory_space<vmem>>, vector<32x128xf32>
    %c0_7 = arith.constant 0 : index
    %c0_8 = arith.constant 0 : index
    %8 = vector.load %arg6[%c0_7, %c0_8] : memref<1x32xf32, #tpu.memory_space<vmem>>, vector<1x32xf32>
    %c0_9 = arith.constant 0 : index
    %c0_10 = arith.constant 0 : index
    %9 = vector.load %arg1[%c0_9, %c0_10] : memref<2x32xf32, #tpu.memory_space<vmem>>, vector<2x32xf32>
    %c0_11 = arith.constant 0 : index
    %c0_12 = arith.constant 0 : index
    %10 = vector.load %arg2[%c0_11, %c0_12] : memref<2x32xf32, #tpu.memory_space<vmem>>, vector<2x32xf32>
    %11 = vector.extract_strided_slice %6 {offsets = [0, 0, 0], sizes = [2, 1, 128], strides = [1, 1, 1]} : vector<2x8x128xf32> to vector<2x1x128xf32>
    %12 = vector.shape_cast %11 : vector<2x1x128xf32> to vector<2x128xf32>
    %cst_13 = arith.constant dense<0.000000e+00> : vector<2x128xf32>
    %13 = tpu.matmul %9, %7, %cst_13 {dimension_numbers = #tpu.dot_dimension_numbers<[1], [0], [0], [1], [0, 0, 1, 1], [], []>} : vector<2x32xf32>, vector<32x128xf32>, vector<2x128xf32> -> vector<2x128xf32>
    %14 = arith.addf %12, %13 : vector<2x128xf32>
    %15 = arith.negf %14 : vector<2x128xf32>
    %16 = math.exp %15 : vector<2x128xf32>
    %cst_14 = arith.constant 1.000000e+00 : f32
    %17 = vector.broadcast %cst_14 : f32 to vector<2x128xf32>
    %18 = arith.addf %17, %16 : vector<2x128xf32>
    %19 = arith.divf %17, %18 : vector<2x128xf32>
    %20 = vector.extract_strided_slice %19 {offsets = [0, 0], sizes = [2, 32], strides = [1, 1]} : vector<2x128xf32> to vector<2x32xf32>
    %21 = vector.extract_strided_slice %19 {offsets = [0, 32], sizes = [2, 32], strides = [1, 1]} : vector<2x128xf32> to vector<2x32xf32>
    %22 = vector.extract_strided_slice %14 {offsets = [0, 64], sizes = [2, 32], strides = [1, 1]} : vector<2x128xf32> to vector<2x32xf32>
    %23 = math.tanh %22 : vector<2x32xf32>
    %24 = vector.extract_strided_slice %19 {offsets = [0, 96], sizes = [2, 32], strides = [1, 1]} : vector<2x128xf32> to vector<2x32xf32>
    %25 = arith.mulf %21, %10 : vector<2x32xf32>
    %26 = arith.mulf %20, %23 : vector<2x32xf32>
    %27 = arith.addf %25, %26 : vector<2x32xf32>
    %28 = math.tanh %27 : vector<2x32xf32>
    %29 = arith.mulf %24, %28 : vector<2x32xf32>
    %30 = vector.extract_strided_slice %6 {offsets = [0, 1, 0], sizes = [2, 1, 128], strides = [1, 1, 1]} : vector<2x8x128xf32> to vector<2x1x128xf32>
    %31 = vector.shape_cast %30 : vector<2x1x128xf32> to vector<2x128xf32>
    %cst_15 = arith.constant dense<0.000000e+00> : vector<2x128xf32>
    %32 = tpu.matmul %29, %7, %cst_15 {dimension_numbers = #tpu.dot_dimension_numbers<[1], [0], [0], [1], [0, 0, 1, 1], [], []>} : vector<2x32xf32>, vector<32x128xf32>, vector<2x128xf32> -> vector<2x128xf32>
    %33 = arith.addf %31, %32 : vector<2x128xf32>
    %34 = arith.negf %33 : vector<2x128xf32>
    %35 = math.exp %34 : vector<2x128xf32>
    %cst_16 = arith.constant 1.000000e+00 : f32
    %36 = vector.broadcast %cst_16 : f32 to vector<2x128xf32>
    %37 = arith.addf %36, %35 : vector<2x128xf32>
    %38 = arith.divf %36, %37 : vector<2x128xf32>
    %39 = vector.extract_strided_slice %38 {offsets = [0, 0], sizes = [2, 32], strides = [1, 1]} : vector<2x128xf32> to vector<2x32xf32>
    %40 = vector.extract_strided_slice %38 {offsets = [0, 32], sizes = [2, 32], strides = [1, 1]} : vector<2x128xf32> to vector<2x32xf32>
    %41 = vector.extract_strided_slice %33 {offsets = [0, 64], sizes = [2, 32], strides = [1, 1]} : vector<2x128xf32> to vector<2x32xf32>
    %42 = math.tanh %41 : vector<2x32xf32>
    %43 = vector.extract_strided_slice %38 {offsets = [0, 96], sizes = [2, 32], strides = [1, 1]} : vector<2x128xf32> to vector<2x32xf32>
    %44 = arith.mulf %40, %27 : vector<2x32xf32>
    %45 = arith.mulf %39, %42 : vector<2x32xf32>
    %46 = arith.addf %44, %45 : vector<2x32xf32>
    %47 = math.tanh %46 : vector<2x32xf32>
    %48 = arith.mulf %43, %47 : vector<2x32xf32>
    %49 = vector.extract_strided_slice %6 {offsets = [0, 2, 0], sizes = [2, 1, 128], strides = [1, 1, 1]} : vector<2x8x128xf32> to vector<2x1x128xf32>
    %50 = vector.shape_cast %49 : vector<2x1x128xf32> to vector<2x128xf32>
    %cst_17 = arith.constant dense<0.000000e+00> : vector<2x128xf32>
    %51 = tpu.matmul %48, %7, %cst_17 {dimension_numbers = #tpu.dot_dimension_numbers<[1], [0], [0], [1], [0, 0, 1, 1], [], []>} : vector<2x32xf32>, vector<32x128xf32>, vector<2x128xf32> -> vector<2x128xf32>
    %52 = arith.addf %50, %51 : vector<2x128xf32>
    %53 = arith.negf %52 : vector<2x128xf32>
    %54 = math.exp %53 : vector<2x128xf32>
    %cst_18 = arith.constant 1.000000e+00 : f32
    %55 = vector.broadcast %cst_18 : f32 to vector<2x128xf32>
    %56 = arith.addf %55, %54 : vector<2x128xf32>
    %57 = arith.divf %55, %56 : vector<2x128xf32>
    %58 = vector.extract_strided_slice %57 {offsets = [0, 0], sizes = [2, 32], strides = [1, 1]} : vector<2x128xf32> to vector<2x32xf32>
    %59 = vector.extract_strided_slice %57 {offsets = [0, 32], sizes = [2, 32], strides = [1, 1]} : vector<2x128xf32> to vector<2x32xf32>
    %60 = vector.extract_strided_slice %52 {offsets = [0, 64], sizes = [2, 32], strides = [1, 1]} : vector<2x128xf32> to vector<2x32xf32>
    %61 = math.tanh %60 : vector<2x32xf32>
    %62 = vector.extract_strided_slice %57 {offsets = [0, 96], sizes = [2, 32], strides = [1, 1]} : vector<2x128xf32> to vector<2x32xf32>
    %63 = arith.mulf %59, %46 : vector<2x32xf32>
    %64 = arith.mulf %58, %61 : vector<2x32xf32>
    %65 = arith.addf %63, %64 : vector<2x32xf32>
    %66 = math.tanh %65 : vector<2x32xf32>
    %67 = arith.mulf %62, %66 : vector<2x32xf32>
    %68 = vector.extract_strided_slice %6 {offsets = [0, 3, 0], sizes = [2, 1, 128], strides = [1, 1, 1]} : vector<2x8x128xf32> to vector<2x1x128xf32>
    %69 = vector.shape_cast %68 : vector<2x1x128xf32> to vector<2x128xf32>
    %cst_19 = arith.constant dense<0.000000e+00> : vector<2x128xf32>
    %70 = tpu.matmul %67, %7, %cst_19 {dimension_numbers = #tpu.dot_dimension_numbers<[1], [0], [0], [1], [0, 0, 1, 1], [], []>} : vector<2x32xf32>, vector<32x128xf32>, vector<2x128xf32> -> vector<2x128xf32>
    %71 = arith.addf %69, %70 : vector<2x128xf32>
    %72 = arith.negf %71 : vector<2x128xf32>
    %73 = math.exp %72 : vector<2x128xf32>
    %cst_20 = arith.constant 1.000000e+00 : f32
    %74 = vector.broadcast %cst_20 : f32 to vector<2x128xf32>
    %75 = arith.addf %74, %73 : vector<2x128xf32>
    %76 = arith.divf %74, %75 : vector<2x128xf32>
    %77 = vector.extract_strided_slice %76 {offsets = [0, 0], sizes = [2, 32], strides = [1, 1]} : vector<2x128xf32> to vector<2x32xf32>
    %78 = vector.extract_strided_slice %76 {offsets = [0, 32], sizes = [2, 32], strides = [1, 1]} : vector<2x128xf32> to vector<2x32xf32>
    %79 = vector.extract_strided_slice %71 {offsets = [0, 64], sizes = [2, 32], strides = [1, 1]} : vector<2x128xf32> to vector<2x32xf32>
    %80 = math.tanh %79 : vector<2x32xf32>
    %81 = vector.extract_strided_slice %76 {offsets = [0, 96], sizes = [2, 32], strides = [1, 1]} : vector<2x128xf32> to vector<2x32xf32>
    %82 = arith.mulf %78, %65 : vector<2x32xf32>
    %83 = arith.mulf %77, %80 : vector<2x32xf32>
    %84 = arith.addf %82, %83 : vector<2x32xf32>
    %85 = math.tanh %84 : vector<2x32xf32>
    %86 = arith.mulf %81, %85 : vector<2x32xf32>
    %87 = vector.extract_strided_slice %6 {offsets = [0, 4, 0], sizes = [2, 1, 128], strides = [1, 1, 1]} : vector<2x8x128xf32> to vector<2x1x128xf32>
    %88 = vector.shape_cast %87 : vector<2x1x128xf32> to vector<2x128xf32>
    %cst_21 = arith.constant dense<0.000000e+00> : vector<2x128xf32>
    %89 = tpu.matmul %86, %7, %cst_21 {dimension_numbers = #tpu.dot_dimension_numbers<[1], [0], [0], [1], [0, 0, 1, 1], [], []>} : vector<2x32xf32>, vector<32x128xf32>, vector<2x128xf32> -> vector<2x128xf32>
    %90 = arith.addf %88, %89 : vector<2x128xf32>
    %91 = arith.negf %90 : vector<2x128xf32>
    %92 = math.exp %91 : vector<2x128xf32>
    %cst_22 = arith.constant 1.000000e+00 : f32
    %93 = vector.broadcast %cst_22 : f32 to vector<2x128xf32>
    %94 = arith.addf %93, %92 : vector<2x128xf32>
    %95 = arith.divf %93, %94 : vector<2x128xf32>
    %96 = vector.extract_strided_slice %95 {offsets = [0, 0], sizes = [2, 32], strides = [1, 1]} : vector<2x128xf32> to vector<2x32xf32>
    %97 = vector.extract_strided_slice %95 {offsets = [0, 32], sizes = [2, 32], strides = [1, 1]} : vector<2x128xf32> to vector<2x32xf32>
    %98 = vector.extract_strided_slice %90 {offsets = [0, 64], sizes = [2, 32], strides = [1, 1]} : vector<2x128xf32> to vector<2x32xf32>
    %99 = math.tanh %98 : vector<2x32xf32>
    %100 = vector.extract_strided_slice %95 {offsets = [0, 96], sizes = [2, 32], strides = [1, 1]} : vector<2x128xf32> to vector<2x32xf32>
    %101 = arith.mulf %97, %84 : vector<2x32xf32>
    %102 = arith.mulf %96, %99 : vector<2x32xf32>
    %103 = arith.addf %101, %102 : vector<2x32xf32>
    %104 = math.tanh %103 : vector<2x32xf32>
    %105 = arith.mulf %100, %104 : vector<2x32xf32>
    %106 = vector.extract_strided_slice %6 {offsets = [0, 5, 0], sizes = [2, 1, 128], strides = [1, 1, 1]} : vector<2x8x128xf32> to vector<2x1x128xf32>
    %107 = vector.shape_cast %106 : vector<2x1x128xf32> to vector<2x128xf32>
    %cst_23 = arith.constant dense<0.000000e+00> : vector<2x128xf32>
    %108 = tpu.matmul %105, %7, %cst_23 {dimension_numbers = #tpu.dot_dimension_numbers<[1], [0], [0], [1], [0, 0, 1, 1], [], []>} : vector<2x32xf32>, vector<32x128xf32>, vector<2x128xf32> -> vector<2x128xf32>
    %109 = arith.addf %107, %108 : vector<2x128xf32>
    %110 = arith.negf %109 : vector<2x128xf32>
    %111 = math.exp %110 : vector<2x128xf32>
    %cst_24 = arith.constant 1.000000e+00 : f32
    %112 = vector.broadcast %cst_24 : f32 to vector<2x128xf32>
    %113 = arith.addf %112, %111 : vector<2x128xf32>
    %114 = arith.divf %112, %113 : vector<2x128xf32>
    %115 = vector.extract_strided_slice %114 {offsets = [0, 0], sizes = [2, 32], strides = [1, 1]} : vector<2x128xf32> to vector<2x32xf32>
    %116 = vector.extract_strided_slice %114 {offsets = [0, 32], sizes = [2, 32], strides = [1, 1]} : vector<2x128xf32> to vector<2x32xf32>
    %117 = vector.extract_strided_slice %109 {offsets = [0, 64], sizes = [2, 32], strides = [1, 1]} : vector<2x128xf32> to vector<2x32xf32>
    %118 = math.tanh %117 : vector<2x32xf32>
    %119 = vector.extract_strided_slice %114 {offsets = [0, 96], sizes = [2, 32], strides = [1, 1]} : vector<2x128xf32> to vector<2x32xf32>
    %120 = arith.mulf %116, %103 : vector<2x32xf32>
    %121 = arith.mulf %115, %118 : vector<2x32xf32>
    %122 = arith.addf %120, %121 : vector<2x32xf32>
    %123 = math.tanh %122 : vector<2x32xf32>
    %124 = arith.mulf %119, %123 : vector<2x32xf32>
    %125 = vector.extract_strided_slice %6 {offsets = [0, 6, 0], sizes = [2, 1, 128], strides = [1, 1, 1]} : vector<2x8x128xf32> to vector<2x1x128xf32>
    %126 = vector.shape_cast %125 : vector<2x1x128xf32> to vector<2x128xf32>
    %cst_25 = arith.constant dense<0.000000e+00> : vector<2x128xf32>
    %127 = tpu.matmul %124, %7, %cst_25 {dimension_numbers = #tpu.dot_dimension_numbers<[1], [0], [0], [1], [0, 0, 1, 1], [], []>} : vector<2x32xf32>, vector<32x128xf32>, vector<2x128xf32> -> vector<2x128xf32>
    %128 = arith.addf %126, %127 : vector<2x128xf32>
    %129 = arith.negf %128 : vector<2x128xf32>
    %130 = math.exp %129 : vector<2x128xf32>
    %cst_26 = arith.constant 1.000000e+00 : f32
    %131 = vector.broadcast %cst_26 : f32 to vector<2x128xf32>
    %132 = arith.addf %131, %130 : vector<2x128xf32>
    %133 = arith.divf %131, %132 : vector<2x128xf32>
    %134 = vector.extract_strided_slice %133 {offsets = [0, 0], sizes = [2, 32], strides = [1, 1]} : vector<2x128xf32> to vector<2x32xf32>
    %135 = vector.extract_strided_slice %133 {offsets = [0, 32], sizes = [2, 32], strides = [1, 1]} : vector<2x128xf32> to vector<2x32xf32>
    %136 = vector.extract_strided_slice %128 {offsets = [0, 64], sizes = [2, 32], strides = [1, 1]} : vector<2x128xf32> to vector<2x32xf32>
    %137 = math.tanh %136 : vector<2x32xf32>
    %138 = vector.extract_strided_slice %133 {offsets = [0, 96], sizes = [2, 32], strides = [1, 1]} : vector<2x128xf32> to vector<2x32xf32>
    %139 = arith.mulf %135, %122 : vector<2x32xf32>
    %140 = arith.mulf %134, %137 : vector<2x32xf32>
    %141 = arith.addf %139, %140 : vector<2x32xf32>
    %142 = math.tanh %141 : vector<2x32xf32>
    %143 = arith.mulf %138, %142 : vector<2x32xf32>
    %144 = vector.extract_strided_slice %6 {offsets = [0, 7, 0], sizes = [2, 1, 128], strides = [1, 1, 1]} : vector<2x8x128xf32> to vector<2x1x128xf32>
    %145 = vector.shape_cast %144 : vector<2x1x128xf32> to vector<2x128xf32>
    %cst_27 = arith.constant dense<0.000000e+00> : vector<2x128xf32>
    %146 = tpu.matmul %143, %7, %cst_27 {dimension_numbers = #tpu.dot_dimension_numbers<[1], [0], [0], [1], [0, 0, 1, 1], [], []>} : vector<2x32xf32>, vector<32x128xf32>, vector<2x128xf32> -> vector<2x128xf32>
    %147 = arith.addf %145, %146 : vector<2x128xf32>
    %148 = arith.negf %147 : vector<2x128xf32>
    %149 = math.exp %148 : vector<2x128xf32>
    %cst_28 = arith.constant 1.000000e+00 : f32
    %150 = vector.broadcast %cst_28 : f32 to vector<2x128xf32>
    %151 = arith.addf %150, %149 : vector<2x128xf32>
    %152 = arith.divf %150, %151 : vector<2x128xf32>
    %153 = vector.extract_strided_slice %152 {offsets = [0, 0], sizes = [2, 32], strides = [1, 1]} : vector<2x128xf32> to vector<2x32xf32>
    %154 = vector.extract_strided_slice %152 {offsets = [0, 32], sizes = [2, 32], strides = [1, 1]} : vector<2x128xf32> to vector<2x32xf32>
    %155 = vector.extract_strided_slice %147 {offsets = [0, 64], sizes = [2, 32], strides = [1, 1]} : vector<2x128xf32> to vector<2x32xf32>
    %156 = math.tanh %155 : vector<2x32xf32>
    %157 = vector.extract_strided_slice %152 {offsets = [0, 96], sizes = [2, 32], strides = [1, 1]} : vector<2x128xf32> to vector<2x32xf32>
    %158 = arith.mulf %154, %141 : vector<2x32xf32>
    %159 = arith.mulf %153, %156 : vector<2x32xf32>
    %160 = arith.addf %158, %159 : vector<2x32xf32>
    %161 = math.tanh %160 : vector<2x32xf32>
    %162 = arith.mulf %157, %161 : vector<2x32xf32>
    %c0_29 = arith.constant 0 : index
    %c0_30 = arith.constant 0 : index
    %163 = vector.load %arg9[%c0_29, %c0_30] : memref<2x32xf32, #tpu.memory_space<vmem>>, vector<2x32xf32>
    tpu.vector_store %arg9[%c0_29, %c0_30], %162 {strides = array<i32>} : memref<2x32xf32, #tpu.memory_space<vmem>>, vector<2x32xf32>,
    %c0_31 = arith.constant 0 : index
    %c0_32 = arith.constant 0 : index
    %164 = vector.load %arg10[%c0_31, %c0_32] : memref<2x32xf32, #tpu.memory_space<vmem>>, vector<2x32xf32>
    tpu.vector_store %arg10[%c0_31, %c0_32], %160 {strides = array<i32>} : memref<2x32xf32, #tpu.memory_space<vmem>>, vector<2x32xf32>,
    %165 = vector.shape_cast %29 : vector<2x32xf32> to vector<2x1x32xf32>
    %166 = vector.shape_cast %48 : vector<2x32xf32> to vector<2x1x32xf32>
    %167 = vector.shape_cast %67 : vector<2x32xf32> to vector<2x1x32xf32>
    %168 = vector.shape_cast %86 : vector<2x32xf32> to vector<2x1x32xf32>
    %169 = vector.shape_cast %105 : vector<2x32xf32> to vector<2x1x32xf32>
    %170 = vector.shape_cast %124 : vector<2x32xf32> to vector<2x1x32xf32>
    %171 = vector.shape_cast %143 : vector<2x32xf32> to vector<2x1x32xf32>
    %172 = vector.shape_cast %162 : vector<2x32xf32> to vector<2x1x32xf32>
    %173 = tpu.concatenate %165, %166, %167, %168, %169, %170, %171, %172 in 1 : vector<2x1x32xf32>, vector<2x1x32xf32>, vector<2x1x32xf32>, vector<2x1x32xf32>, vector<2x1x32xf32>, vector<2x1x32xf32>, vector<2x1x32xf32>, vector<2x1x32xf32> -> vector<2x8x32xf32>
    %174 = vector.shape_cast %8 : vector<1x32xf32> to vector<1x1x32xf32>
    %175 = vector.broadcast %174 : vector<1x1x32xf32> to vector<2x8x32xf32>
    %176 = arith.mulf %173, %175 : vector<2x8x32xf32>
    %cst_33 = arith.constant dense<0.000000e+00> : vector<2x8xf32>
    %177 = vector.multi_reduction <add>, %176, %cst_33 [2] : vector<2x8x32xf32> to vector<2x8xf32>
    %c0_34 = arith.constant 0 : index
    %c0_35 = arith.constant 0 : index
    %178 = vector.load %arg7[%c0_34, %c0_35] : memref<1x1xf32, #tpu.memory_space<vmem>>, vector<1x1xf32>
    %179 = vector.broadcast %178 : vector<1x1xf32> to vector<2x8xf32>
    %180 = arith.addf %177, %179 : vector<2x8xf32>
    %c0_36 = arith.constant 0 : index
    %c0_37 = arith.constant 0 : index
    %181 = vector.load %arg8[%c0_36, %c0_37] : memref<2x8xf32, #tpu.memory_space<vmem>>, vector<2x8xf32>
    tpu.vector_store %arg8[%c0_36, %c0_37], %180 {strides = array<i32>} : memref<2x8xf32, #tpu.memory_space<vmem>>, vector<2x8xf32>,
    return
  }
}

</mosaic_0001>

<bundles_post_ra>
// kernel: lstm_forward.1
= control target key start
LH: loop header
LB: loop body
LE: loop exit
PB: predicated region body
PF: predicated region fallthrough
CT: control target
= control target key end

     0   :  { %s2133_s0 = inlined_call_operand.vmem [shape: f32[16,16], index: 0, kind: input, shape index: {}]   ;;  %s2134_s1 = inlined_call_operand.vmem [shape: f32[2,32], index: 1, kind: input, shape index: {}]   ;;  %s2135_s2 = inlined_call_operand.vmem [shape: f32[2,32], index: 2, kind: input, shape index: {}]   ;;  %s2136_s3 = inlined_call_operand.vmem [shape: f32[16,128], index: 3, kind: input, shape index: {}]   ;;  %s2137_s4 = inlined_call_operand.vmem [shape: f32[32,128], index: 4, kind: input, shape index: {}]   ;;  %s2138_s5 = inlined_call_operand.vmem [shape: f32[1,128], index: 5, kind: input, shape index: {}]   ;;  %s2139_s6 = inlined_call_operand.vmem [shape: f32[1,32], index: 6, kind: input, shape index: {}]   ;;  %s2140_s7 = inlined_call_operand.<no memory space> [shape: f32[1,1], index: 7, kind: input, shape index: {}]   ;;  %s2141_s8 = inlined_call_operand.hbm [shape: f32[2,8], index: 8, kind: output, shape index: {0}]   ;;  %s2142_s9 = inlined_call_operand.hbm [shape: f32[2,32], index: 9, kind: output, shape index: {1}]   ;;  %s2143_s10 = inlined_call_operand.hbm [shape: f32[2,32], index: 10, kind: output, shape index: {2}]  }
   0x1   :  { %v16_v0 = vstv %s2140_s7 }
   0x2   :  { %17 = vst [vmem:[#allocation2] sm:$0x1] %v16_v0 }
   0x3   :  { %18 = vsyncpa [#allocation4], 0  ;;  %v38_v1 = vld [vmem:[%s2136_s3] sm:$0xff]  ;;  %v39_v2 = vld [vmem:[%s2136_s3 + $0x8] sm:$0xff]  ;;  %vm47_vm0 = vcmask 130048   ;;  %v1817_v4 = vmov 0.0|0.0  }
   0x4   :  { %v129_v3 = vld [vmem:[%s2137_s4] sm:$0xff]  ;;  %1560 = vmatprep.subr.bf16.mxu1 %v1817_v4  ;;  %v1556_v5 = vpack.c.bf16 %v39_v2, %v38_v1  ;;  %v130_v6 = vld [vmem:[%s2137_s4 + $0x8] sm:$0xff]  ;;  %v131_v9 = vld [vmem:[%s2137_s4 + $0x10] sm:$0xff]  ;;  %vm1818_vm1 = vmmov 0   ;;  %v1819_v11 = vmov 0.0  }
   0x5   :  { %v36_v7 = vld [vmem:[%s2133_s0] sm:$0xff]  ;;  %v1901_v8 = vpack.c.bf16 %v130_v6, %v129_v3  ;;  %v132_v10 = vld [vmem:[%s2137_s4 + $0x18] sm:$0xff]  ;;  %1476 = vmatprep.mubr.msk.f32.mxu1 %vm1818_vm1, %v1819_v11 }
   0x6   :  { %1465 = vmatprep.mubr.msk.f32.mxu0 %vm47_vm0, %v36_v7  ;;  %1557 = vmatprep.subr.bf16.mxu0 %v1556_v5  ;;  %v135_v12 = vld [vmem:[%s2135_s2] sm:$0x3] }
   0x7   :  { %19 = vsyncpa [#allocation6], 0  ;;  %1562 = vmatpush3.bf16.msra.mxu1 %v1901_v8  ;;  %1559 = vmatpush3.bf16.msra.mxu0 %v1556_v5  ;;  %v37_v13 = vld [vmem:[%s2133_s0 + $0x8] sm:$0xff]  ;;  %v1919_v14 = vpack.c.bf16 %v132_v10, %v131_v9  ;;  %v231_v15 = vrot.slane %v135_v12, 1  ;;  %s1820_s4 = smov 32   ;;  %vm136_vm2 = vcmask 261120  }
   0x8   :  { %1563 = vmatprep.subr.bf16.mxu1 %v1817_v4  ;;  %1566 = vmatprep.subr.bf16.mxu0 %v1817_v4  ;;  %v134_v16 = vld [vmem:[%s2134_s1] sm:$0x3]  ;;  %s1821_s12 = smov 64   ;;  %vm275_vm3 = vcmask 1041409   ;;  %vm1274_vm4 = vcmask 1040384   ;;  %vm1277_vm5 = vcmask 1041408  }
   0x9   :  { %234 = vrot.lane.b32.xlu1 %v231_v15, %s1820_s4  ;;  %v1388_v19 = vld [vmem:[%s2138_s5] ss:$0 sm:$0xff]  ;;  %vm1280_vm6 = vcmask 1042432   ;;  %vm1283_vm7 = vcmask 1043456   ;;  %vm1286_vm8 = vcmask 1044480   ;;  %vm1289_vm9 = vcmask 1045504  }
   0xa   :  { %1466 = vmatmul.mubr.msk.f32.vlgmr.msra.gmra.mrb[0].mxu0 %vm47_vm0, %v37_v13  ;;  %s1822_s14 = smov 96   ;;  %vm1292_vm10 = vcmask 1046528   ;;  %vm1259_vm11 = vcmask 261127   ;;  %vm1261_vm12 = vcmask 253952  }
   0xb   :  { %1565 = vmatpush3.bf16.msra.mxu1 %v1919_v14  ;;  %1568 = vmatpush3.bf16.msra.mxu0 %v1901_v8 }
   0xc   :  { %1569 = vmatprep.subr.bf16.mxu0 %v1817_v4  ;;  %1487 = vmatprep.mubr.msk.f32.mxu0 %vm1818_vm1, %v1819_v11 }
   0xd   :  { %232 = vrot.lane.b32.xlu1 %v135_v12, %s1820_s4  ;;  %1572 = vmatprep.subr.bf16.mxu1 %v1817_v4 }
   0xe   :  { %1477 = vmatmul.mubr.msk.f32.vlgmr.msra.gmra.mrb[0].mxu1 %vm136_vm2, %v134_v16 }
   0xf   :  { %1571 = vmatpush3.bf16.msra.mxu0 %v1919_v14  ;;  %1574 = vmatpush3.bf16.msra.mxu1 %v1901_v8 }
  0x10   :  { %1575 = vmatprep.subr.bf16.mxu1 %v1817_v4  ;;  %1498 = vmatprep.mubr.msk.f32.mxu1 %vm1818_vm1, %v1819_v11 }
  0x11   :  { %1578 = vmatprep.subr.bf16.mxu0 %v1817_v4 }
  0x13   :  { %1577 = vmatpush3.bf16.msra.mxu1 %v1919_v14 }
  0x14   :  { %1584 = vmatprep.subr.bf16.mxu1 %v1817_v4 }
  0x7b   :  { %v235_v41 = vpop.permute.xlu1 %234 }
  0x7f   :  { %v233_v43 = vpop.permute.xlu1 %232 }
  0xdd   :  { %v1467_v17 = vpop.f32.mrb[0].mxu0 }
  0xde   :  { %v120_v18 = vpop.f32.mrb[1].mxu0  ;;  %v1947_v20 = vadd.f32 %v1467_v17, %v1388_v19 }
  0xdf   :  { %v1949_v24 = vadd.f32 %v1388_v19, %v120_v18 }
  0xe1   :  { %v206_v21 = vpop.f32.mrb[0].mxu1 }
  0xe2   :  { %v211_v22 = vrot.slane %v206_v21, 1  ;;  %v1478_v23 = vpop.f32.mrb[1].mxu1  ;;  %v214_v26 = vadd.f32 %v206_v21, %v1949_v24 }
  0xe4   :  { %v215_v25 = vadd.f32 %v211_v22, %v1947_v20  ;;  %v1392_v30 = vmul.f32 -1.442695, %v214_v26 }
  0xe6   :  { %1619 = vtanh.f32 %v215_v25  ;;  %v1393_v29 = vmul.f32 -1.442695, %v215_v25 }
  0xe7   :  { %1621 = vtanh.f32 %v214_v26 }
  0xe8   :  { %1623 = vpow2.f32 %v1393_v29 }
  0xe9   :  { %1625 = vpow2.f32 %v1392_v30 }
  0xf0   :  { %v1620_v27 = vpop.eup %1619 }
  0xf1   :  { %244 = vrot.lane.b32.xlu0 %v1620_v27, %s1821_s12  ;;  %v1622_v28 = vpop.eup %1621 }
  0xf2   :  { %v1624_v31 = vpop.eup %1623 }
  0xf3   :  { %v223_v32 = vadd.f32 1.0, %v1624_v31  ;;  %v1626_v33 = vpop.eup %1625 }
  0xf4   :  { %v222_v34 = vadd.f32 1.0, %v1626_v33 }
  0xf5   :  { %242 = vrot.lane.b32.xlu0 %v1622_v28, %s1821_s12  ;;  %1627 = vrcp.f32 %v223_v32 }
  0xf6   :  { %1629 = vrcp.f32 %v222_v34 }
  0xff   :  { %v1628_v35 = vpop.eup %1627 }
 0x100   :  { %v1630_v38 = vpop.eup %1629  ;;  %v239_v42 = vmul.f32 %v1628_v35, %v235_v41 }
 0x101   :  { %v238_v46 = vmul.f32 %v1630_v38, %v233_v43 }
 0x163   :  { %v245_v36 = vpop.permute.xlu0 %244 }
 0x164   :  { %v249_v37 = vmul.f32 %v1628_v35, %v245_v36 }
 0x166   :  { %254 = vrot.lane.b32.xlu0 %v249_v37, %s1820_s4 }
 0x167   :  { %v243_v39 = vpop.permute.xlu0 %242 }
 0x168   :  { %v248_v40 = vmul.f32 %v1630_v38, %v243_v39 }
 0x16a   :  { %252 = vrot.lane.b32.xlu1 %v248_v40, %s1820_s4 }
 0x1d8   :  { %v255_v44 = vpop.permute.xlu0 %254 }
 0x1d9   :  { %v259_v45 = vadd.f32 %v255_v44, %v239_v42 }
 0x1db   :  { %1631 = vtanh.f32 %v259_v45  ;;  %v374_v17 = vrot.slane %v259_v45, 7 }
 0x1dc   :  { %v253_v47 = vpop.permute.xlu1 %252 }
 0x1dd   :  { %v258_v48 = vadd.f32 %v253_v47, %v238_v46 }
 0x1df   :  { %1633 = vtanh.f32 %v258_v48  ;;  %v373_v19 = vrot.slane %v258_v48, 7 }
 0x1e5   :  { %v1632_v49 = vpop.eup %1631 }
 0x1e6   :  { %266 = vrot.lane.b32.xlu0 %v1632_v49, %s1821_s12 }
 0x1e9   :  { %v1634_v50 = vpop.eup %1633 }
 0x1ea   :  { %264 = vrot.lane.b32.xlu1 %v1634_v50, %s1821_s12 }
 0x258   :  { %v267_v51 = vpop.permute.xlu0 %266 }
 0x259   :  { %v1959_v52 = vmul.f32 %v1628_v35, %v267_v51 }
 0x25b   :  { %v274_v54 = vrot.slane %v1959_v52, 7 }
 0x25c   :  { %v265_v53 = vpop.permute.xlu1 %264 }
 0x25d   :  { %v1962_v55 = vmul.f32 %v1630_v38, %v265_v53 }
 0x25f   :  { %v276_v56 = vsel %vm275_vm3, %v274_v54, %v1962_v55 }
 0x260   :  { %277 = vrot.lane.b32.xlu0 %v276_v56, %s1820_s4 }
 0x2d2   :  { %v278_v57 = vpop.permute.xlu0 %277 }
 0x2d3   :  { %1488 = vmatmul.mubr.msk.f32.vlgmr.msra.gmra.mrb[2].mxu0 %vm136_vm2, %v278_v57 }
 0x2d4   :  { %1580 = vmatpush3.bf16.msra.mxu0 %v1901_v8  ;;  %1509 = vmatprep.mubr.msk.f32.mxu0 %vm1818_vm1, %v1819_v11 }
 0x2d5   :  { %1581 = vmatprep.subr.bf16.mxu0 %v1817_v4 }
 0x2d8   :  { %1583 = vmatpush3.bf16.msra.mxu0 %v1919_v14 }
 0x2d9   :  { %1590 = vmatprep.subr.bf16.mxu0 %v1817_v4 }
 0x3a6   :  { %v347_v58 = vpop.f32.mrb[2].mxu0 }
 0x3a7   :  { %v352_v59 = vrot.slane %v347_v58, 7  ;;  %v356_v60 = vadd.f32 %v347_v58, %v1947_v20  ;;  %v1489_v61 = vpop.f32.mrb[3].mxu0 }
 0x3a9   :  { %v355_v62 = vadd.f32 %v352_v59, %v1949_v24  ;;  %1635 = vtanh.f32 %v356_v60  ;;  %v1396_v1 = vmul.f32 -1.442695, %v356_v60 }
 0x3ab   :  { %1637 = vtanh.f32 %v355_v62  ;;  %v1395_v2 = vmul.f32 -1.442695, %v355_v62 }
 0x3ac   :  { %1639 = vpow2.f32 %v1396_v1 }
 0x3ad   :  { %1641 = vpow2.f32 %v1395_v2 }
 0x3b3   :  { %v1636_v63 = vpop.eup %1635 }
 0x3b4   :  { %383 = vrot.lane.b32.xlu0 %v1636_v63, %s1821_s12 }
 0x3b5   :  { %v1638_v0 = vpop.eup %1637 }
 0x3b6   :  { %381 = vrot.lane.b32.xlu1 %v1638_v0, %s1821_s12  ;;  %v1640_v3 = vpop.eup %1639 }
 0x3b7   :  { %v1642_v5 = vpop.eup %1641  ;;  %v364_v6 = vadd.f32 1.0, %v1640_v3 }
 0x3b8   :  { %v363_v7 = vadd.f32 1.0, %v1642_v5 }
 0x3b9   :  { %1643 = vrcp.f32 %v364_v6 }
 0x3ba   :  { %1645 = vrcp.f32 %v363_v7 }
 0x3c3   :  { %v1644_v9 = vpop.eup %1643 }
 0x3c4   :  { %v1646_v13 = vpop.eup %1645  ;;  %v378_v18 = vmul.f32 %v1644_v9, %v374_v17 }
 0x3c5   :  { %v377_v23 = vmul.f32 %v1646_v13, %v373_v19 }
 0x426   :  { %v384_v10 = vpop.permute.xlu0 %383 }
 0x427   :  { %v388_v12 = vmul.f32 %v1644_v9, %v384_v10 }
 0x428   :  { %v382_v15 = vpop.permute.xlu1 %381 }
 0x429   :  { %393 = vrot.lane.b32.xlu0 %v388_v12, %s1820_s4  ;;  %v387_v16 = vmul.f32 %v1646_v13, %v382_v15 }
 0x42b   :  { %391 = vrot.lane.b32.xlu1 %v387_v16, %s1820_s4 }
 0x49b   :  { %v394_v21 = vpop.permute.xlu0 %393 }
 0x49c   :  { %v398_v22 = vadd.f32 %v394_v21, %v378_v18 }
 0x49d   :  { %v392_v25 = vpop.permute.xlu1 %391 }
 0x49e   :  { %1647 = vtanh.f32 %v398_v22  ;;  %v397_v26 = vadd.f32 %v392_v25, %v377_v23  ;;  %v513_v59 = vrot.slane %v398_v22, 7 }
 0x4a0   :  { %1649 = vtanh.f32 %v397_v26  ;;  %v512_v58 = vrot.slane %v397_v26, 7 }
 0x4a8   :  { %v1648_v27 = vpop.eup %1647 }
 0x4a9   :  { %405 = vrot.lane.b32.xlu0 %v1648_v27, %s1821_s12 }
 0x4aa   :  { %v1650_v28 = vpop.eup %1649 }
 0x4ab   :  { %403 = vrot.lane.b32.xlu1 %v1650_v28, %s1821_s12 }
 0x51b   :  { %v406_v29 = vpop.permute.xlu0 %405 }
 0x51c   :  { %v1982_v32 = vmul.f32 %v1644_v9, %v406_v29 }
 0x51d   :  { %v404_v30 = vpop.permute.xlu1 %403 }
 0x51e   :  { %v409_v31 = vmul.f32 %v1646_v13, %v404_v30  ;;  %v1276_v12 = vsel %vm1274_vm4, %v1959_v52, %v1982_v32 }
 0x520   :  { %v413_v33 = vrot.slane %v409_v31, 1  ;;  %v1275_v9 = vsel %vm1274_vm4, %v1962_v55, %v409_v31 }
 0x522   :  { %v414_v34 = vsel %vm275_vm3, %v1982_v32, %v413_v33 }
 0x523   :  { %415 = vrot.lane.b32.xlu1 %v414_v34, %s1820_s4 }
 0x595   :  { %v416_v35 = vpop.permute.xlu1 %415 }
 0x596   :  { %1499 = vmatmul.mubr.msk.f32.vlgmr.msra.gmra.mrb[2].mxu1 %vm136_vm2, %v416_v35 }
 0x597   :  { %1586 = vmatpush3.bf16.msra.mxu1 %v1901_v8  ;;  %1520 = vmatprep.mubr.msk.f32.mxu1 %vm1818_vm1, %v1819_v11 }
 0x598   :  { %1587 = vmatprep.subr.bf16.mxu1 %v1817_v4 }
 0x59b   :  { %1589 = vmatpush3.bf16.msra.mxu1 %v1919_v14 }
 0x59c   :  { %1596 = vmatprep.subr.bf16.mxu1 %v1817_v4 }
 0x669   :  { %v485_v36 = vpop.f32.mrb[2].mxu1 }
 0x66a   :  { %v490_v37 = vrot.slane %v485_v36, 6  ;;  %v491_v38 = vrot.slane %v485_v36, 7  ;;  %v1500_v39 = vpop.f32.mrb[3].mxu1 }
 0x66c   :  { %v494_v40 = vadd.f32 %v490_v37, %v1949_v24  ;;  %v495_v41 = vadd.f32 %v491_v38, %v1947_v20 }
 0x66e   :  { %1651 = vtanh.f32 %v494_v40  ;;  %v1398_v44 = vmul.f32 -1.442695, %v494_v40  ;;  %v1399_v45 = vmul.f32 -1.442695, %v495_v41 }
 0x66f   :  { %1653 = vtanh.f32 %v495_v41 }
 0x670   :  { %1655 = vpow2.f32 %v1398_v44 }
 0x671   :  { %1657 = vpow2.f32 %v1399_v45 }
 0x678   :  { %v1652_v42 = vpop.eup %1651 }
 0x679   :  { %v1654_v43 = vpop.eup %1653  ;;  %520 = vrot.lane.b32.xlu0 %v1652_v42, %s1821_s12 }
 0x67a   :  { %522 = vrot.lane.b32.xlu1 %v1654_v43, %s1821_s12  ;;  %v1656_v46 = vpop.eup %1655 }
 0x67b   :  { %v1658_v47 = vpop.eup %1657  ;;  %v502_v48 = vadd.f32 1.0, %v1656_v46 }
 0x67c   :  { %v503_v49 = vadd.f32 1.0, %v1658_v47 }
 0x67d   :  { %1659 = vrcp.f32 %v502_v48 }
 0x67e   :  { %1661 = vrcp.f32 %v503_v49 }
 0x687   :  { %v1660_v50 = vpop.eup %1659 }
 0x688   :  { %v1662_v53 = vpop.eup %1661  ;;  %v516_v60 = vmul.f32 %v1660_v50, %v512_v58 }
 0x689   :  { %v517_v61 = vmul.f32 %v1662_v53, %v513_v59 }
 0x6eb   :  { %v521_v51 = vpop.permute.xlu0 %520 }
 0x6ec   :  { %v523_v54 = vpop.permute.xlu1 %522  ;;  %v526_v56 = vmul.f32 %v1660_v50, %v521_v51 }
 0x6ed   :  { %v527_v57 = vmul.f32 %v1662_v53, %v523_v54 }
 0x6ee   :  { %530 = vrot.lane.b32.xlu0 %v526_v56, %s1820_s4 }
 0x6ef   :  { %532 = vrot.lane.b32.xlu1 %v527_v57, %s1820_s4 }
 0x760   :  { %v531_v62 = vpop.permute.xlu0 %530 }
 0x761   :  { %v533_v63 = vpop.permute.xlu1 %532  ;;  %v536_v0 = vadd.f32 %v531_v62, %v516_v60 }
 0x762   :  { %v537_v1 = vadd.f32 %v533_v63, %v517_v61 }
 0x763   :  { %1663 = vtanh.f32 %v536_v0  ;;  %v652_v40 = vrot.slane %v536_v0, 7 }
 0x764   :  { %1665 = vtanh.f32 %v537_v1  ;;  %v653_v41 = vrot.slane %v537_v1, 7 }
 0x76d   :  { %v1664_v2 = vpop.eup %1663 }
 0x76e   :  { %v1666_v3 = vpop.eup %1665  ;;  %542 = vrot.lane.b32.xlu0 %v1664_v2, %s1821_s12 }
 0x76f   :  { %544 = vrot.lane.b32.xlu1 %v1666_v3, %s1821_s12 }
 0x7e0   :  { %v543_v5 = vpop.permute.xlu0 %542 }
 0x7e1   :  { %v545_v6 = vpop.permute.xlu1 %544  ;;  %v548_v7 = vmul.f32 %v1660_v50, %v543_v5 }
 0x7e2   :  { %v549_v10 = vmul.f32 %v1662_v53, %v545_v6 }
 0x7e3   :  { %v552_v13 = vrot.slane %v548_v7, 2  ;;  %v2005_v15 = vsel %vm1277_vm5, %v1275_v9, %v548_v7 }
 0x7e4   :  { %v553_v16 = vrot.slane %v549_v10, 1  ;;  %v2007_v17 = vsel %vm1277_vm5, %v1276_v12, %v549_v10 }
 0x7e6   :  { %v554_v18 = vsel %vm275_vm3, %v553_v16, %v552_v13 }
 0x7e7   :  { %555 = vrot.lane.b32.xlu0 %v554_v18, %s1820_s4 }
 0x859   :  { %v556_v19 = vpop.permute.xlu0 %555 }
 0x85a   :  { %1510 = vmatmul.mubr.msk.f32.vlgmr.msra.gmra.mrb[4].mxu0 %vm136_vm2, %v556_v19 }
 0x85b   :  { %1592 = vmatpush3.bf16.msra.mxu0 %v1901_v8  ;;  %1531 = vmatprep.mubr.msk.f32.mxu0 %vm1818_vm1, %v1819_v11 }
 0x85c   :  { %1593 = vmatprep.subr.bf16.mxu0 %v1817_v4 }
 0x85f   :  { %1595 = vmatpush3.bf16.msra.mxu0 %v1919_v14 }
 0x860   :  { %1602 = vmatprep.subr.bf16.mxu0 %v1817_v4 }
 0x92d   :  { %v625_v52 = vpop.f32.mrb[4].mxu0 }
 0x92e   :  { %v630_v55 = vrot.slane %v625_v52, 5  ;;  %v631_v21 = vrot.slane %v625_v52, 6  ;;  %v1511_v22 = vpop.f32.mrb[5].mxu0 }
 0x930   :  { %v634_v23 = vadd.f32 %v630_v55, %v1949_v24  ;;  %v635_v25 = vadd.f32 %v631_v21, %v1947_v20 }
 0x932   :  { %1667 = vtanh.f32 %v634_v23  ;;  %v1401_v28 = vmul.f32 -1.442695, %v634_v23  ;;  %v1402_v29 = vmul.f32 -1.442695, %v635_v25 }
 0x933   :  { %1669 = vtanh.f32 %v635_v25 }
 0x934   :  { %1671 = vpow2.f32 %v1401_v28 }
 0x935   :  { %1673 = vpow2.f32 %v1402_v29 }
 0x93c   :  { %v1668_v26 = vpop.eup %1667 }
 0x93d   :  { %v1670_v27 = vpop.eup %1669  ;;  %660 = vrot.lane.b32.xlu1 %v1668_v26, %s1821_s12 }
 0x93e   :  { %662 = vrot.lane.b32.xlu0 %v1670_v27, %s1821_s12  ;;  %v1672_v30 = vpop.eup %1671 }
 0x93f   :  { %v1674_v31 = vpop.eup %1673  ;;  %v642_v32 = vadd.f32 1.0, %v1672_v30 }
 0x940   :  { %v643_v33 = vadd.f32 1.0, %v1674_v31 }
 0x941   :  { %1675 = vrcp.f32 %v642_v32 }
 0x942   :  { %1677 = vrcp.f32 %v643_v33 }
 0x94b   :  { %v1676_v34 = vpop.eup %1675 }
 0x94c   :  { %v1678_v36 = vpop.eup %1677  ;;  %v656_v42 = vmul.f32 %v1676_v34, %v652_v40 }
 0x94d   :  { %v657_v43 = vmul.f32 %v1678_v36, %v653_v41 }
 0x9af   :  { %v661_v35 = vpop.permute.xlu1 %660 }
 0x9b0   :  { %v663_v37 = vpop.permute.xlu0 %662  ;;  %v666_v38 = vmul.f32 %v1676_v34, %v661_v35 }
 0x9b1   :  { %v667_v39 = vmul.f32 %v1678_v36, %v663_v37 }
 0x9b2   :  { %670 = vrot.lane.b32.xlu1 %v666_v38, %s1820_s4 }
 0x9b3   :  { %672 = vrot.lane.b32.xlu0 %v667_v39, %s1820_s4 }
 0xa24   :  { %v671_v44 = vpop.permute.xlu1 %670 }
 0xa25   :  { %v673_v45 = vpop.permute.xlu0 %672  ;;  %v676_v46 = vadd.f32 %v671_v44, %v656_v42 }
 0xa26   :  { %v677_v47 = vadd.f32 %v673_v45, %v657_v43 }
 0xa27   :  { %1679 = vtanh.f32 %v676_v46  ;;  %v792_v21 = vrot.slane %v676_v46, 7 }
 0xa28   :  { %1681 = vtanh.f32 %v677_v47  ;;  %v793_v22 = vrot.slane %v677_v47, 7 }
 0xa31   :  { %v1680_v48 = vpop.eup %1679 }
 0xa32   :  { %v1682_v49 = vpop.eup %1681  ;;  %682 = vrot.lane.b32.xlu1 %v1680_v48, %s1821_s12 }
 0xa33   :  { %684 = vrot.lane.b32.xlu0 %v1682_v49, %s1821_s12 }
 0xaa4   :  { %v683_v50 = vpop.permute.xlu1 %682 }
 0xaa5   :  { %v685_v51 = vpop.permute.xlu0 %684  ;;  %v688_v53 = vmul.f32 %v1676_v34, %v683_v50 }
 0xaa6   :  { %v689_v54 = vmul.f32 %v1678_v36, %v685_v51 }
 0xaa7   :  { %v692_v56 = vrot.slane %v688_v53, 3  ;;  %v1281_v57 = vsel %vm1280_vm6, %v2005_v15, %v688_v53 }
 0xaa8   :  { %v693_v58 = vrot.slane %v689_v54, 2  ;;  %v1282_v59 = vsel %vm1280_vm6, %v2007_v17, %v689_v54 }
 0xaaa   :  { %v694_v60 = vsel %vm275_vm3, %v693_v58, %v692_v56 }
 0xaab   :  { %695 = vrot.lane.b32.xlu1 %v694_v60, %s1820_s4 }
 0xb1d   :  { %v696_v61 = vpop.permute.xlu1 %695 }
 0xb1e   :  { %1521 = vmatmul.mubr.msk.f32.vlgmr.msra.gmra.mrb[4].mxu1 %vm136_vm2, %v696_v61 }
 0xb1f   :  { %1598 = vmatpush3.bf16.msra.mxu1 %v1901_v8  ;;  %1542 = vmatprep.mubr.msk.f32.mxu1 %vm1818_vm1, %v1819_v11 }
 0xb20   :  { %1599 = vmatprep.subr.bf16.mxu1 %v1817_v4 }
 0xb23   :  { %1601 = vmatpush3.bf16.msra.mxu1 %v1919_v14 }
 0xbf1   :  { %v765_v62 = vpop.f32.mrb[4].mxu1 }
 0xbf2   :  { %v770_v63 = vrot.slane %v765_v62, 4  ;;  %v771_v0 = vrot.slane %v765_v62, 5  ;;  %v1522_v1 = vpop.f32.mrb[5].mxu1 }
 0xbf4   :  { %v774_v2 = vadd.f32 %v770_v63, %v1949_v24  ;;  %v775_v3 = vadd.f32 %v771_v0, %v1947_v20 }
 0xbf6   :  { %1683 = vtanh.f32 %v774_v2  ;;  %v1404_v7 = vmul.f32 -1.442695, %v774_v2  ;;  %v1405_v9 = vmul.f32 -1.442695, %v775_v3 }
 0xbf7   :  { %1685 = vtanh.f32 %v775_v3 }
 0xbf8   :  { %1687 = vpow2.f32 %v1404_v7 }
 0xbf9   :  { %1689 = vpow2.f32 %v1405_v9 }
 0xc00   :  { %v1684_v5 = vpop.eup %1683 }
 0xc01   :  { %v1686_v6 = vpop.eup %1685  ;;  %800 = vrot.lane.b32.xlu0 %v1684_v5, %s1821_s12 }
 0xc02   :  { %802 = vrot.lane.b32.xlu1 %v1686_v6, %s1821_s12  ;;  %v1688_v10 = vpop.eup %1687 }
 0xc03   :  { %v1690_v12 = vpop.eup %1689  ;;  %v782_v13 = vadd.f32 1.0, %v1688_v10 }
 0xc04   :  { %v783_v15 = vadd.f32 1.0, %v1690_v12 }
 0xc05   :  { %1691 = vrcp.f32 %v782_v13 }
 0xc06   :  { %1693 = vrcp.f32 %v783_v15 }
 0xc0f   :  { %v1692_v16 = vpop.eup %1691 }
 0xc10   :  { %v1694_v18 = vpop.eup %1693  ;;  %v796_v23 = vmul.f32 %v1692_v16, %v792_v21 }
 0xc11   :  { %v797_v25 = vmul.f32 %v1694_v18, %v793_v22 }
 0xc73   :  { %v801_v17 = vpop.permute.xlu0 %800 }
 0xc74   :  { %v803_v19 = vpop.permute.xlu1 %802  ;;  %v806_v52 = vmul.f32 %v1692_v16, %v801_v17 }
 0xc75   :  { %v807_v55 = vmul.f32 %v1694_v18, %v803_v19 }
 0xc76   :  { %810 = vrot.lane.b32.xlu0 %v806_v52, %s1820_s4 }
 0xc77   :  { %812 = vrot.lane.b32.xlu1 %v807_v55, %s1820_s4 }
 0xce8   :  { %v811_v26 = vpop.permute.xlu0 %810 }
 0xce9   :  { %v813_v27 = vpop.permute.xlu1 %812  ;;  %v816_v28 = vadd.f32 %v811_v26, %v796_v23 }
 0xcea   :  { %v817_v29 = vadd.f32 %v813_v27, %v797_v25 }
 0xceb   :  { %1695 = vtanh.f32 %v816_v28  ;;  %v932_v60 = vrot.slane %v816_v28, 7 }
 0xcec   :  { %1697 = vtanh.f32 %v817_v29  ;;  %v933_v61 = vrot.slane %v817_v29, 7 }
 0xcf5   :  { %v1696_v30 = vpop.eup %1695 }
 0xcf6   :  { %v1698_v31 = vpop.eup %1697  ;;  %822 = vrot.lane.b32.xlu0 %v1696_v30, %s1821_s12 }
 0xcf7   :  { %824 = vrot.lane.b32.xlu1 %v1698_v31, %s1821_s12 }
 0xd68   :  { %v823_v32 = vpop.permute.xlu0 %822 }
 0xd69   :  { %v825_v33 = vpop.permute.xlu1 %824  ;;  %v828_v34 = vmul.f32 %v1692_v16, %v823_v32 }
 0xd6a   :  { %v829_v35 = vmul.f32 %v1694_v18, %v825_v33 }
 0xd6b   :  { %v832_v36 = vrot.slane %v828_v34, 4  ;;  %v1284_v37 = vsel %vm1283_vm7, %v1281_v57, %v828_v34 }
 0xd6c   :  { %v833_v38 = vrot.slane %v829_v35, 3  ;;  %v1285_v39 = vsel %vm1283_vm7, %v1282_v59, %v829_v35 }
 0xd6e   :  { %v834_v40 = vsel %vm275_vm3, %v833_v38, %v832_v36 }
 0xd6f   :  { %835 = vrot.lane.b32.xlu0 %v834_v40, %s1820_s4 }
 0xde1   :  { %v836_v41 = vpop.permute.xlu0 %835 }
 0xde2   :  { %1532 = vmatmul.mubr.msk.f32.vlgmr.msra.gmra.mrb[6].mxu0 %vm136_vm2, %v836_v41 }
 0xde3   :  { %1604 = vmatpush3.bf16.msra.mxu0 %v1901_v8  ;;  %1553 = vmatprep.mubr.msk.f32.mxu0 %vm1818_vm1, %v1819_v11 }
 0xde4   :  { %1605 = vmatprep.subr.bf16.mxu0 %v1817_v4 }
 0xde7   :  { %1607 = vmatpush3.bf16.msra.mxu0 %v1919_v14 }
 0xeb5   :  { %v905_v42 = vpop.f32.mrb[6].mxu0 }
 0xeb6   :  { %v910_v43 = vrot.slane %v905_v42, 3  ;;  %v911_v44 = vrot.slane %v905_v42, 4  ;;  %v1533_v45 = vpop.f32.mrb[7].mxu0 }
 0xeb8   :  { %v914_v46 = vadd.f32 %v910_v43, %v1949_v24  ;;  %v915_v47 = vadd.f32 %v911_v44, %v1947_v20 }
 0xeba   :  { %1699 = vtanh.f32 %v914_v46  ;;  %v1407_v8 = vmul.f32 -1.442695, %v914_v46  ;;  %v1408_v4 = vmul.f32 -1.442695, %v915_v47 }
 0xebb   :  { %1701 = vtanh.f32 %v915_v47 }
 0xebc   :  { %1703 = vpow2.f32 %v1407_v8 }
 0xebd   :  { %1705 = vpow2.f32 %v1408_v4 }
 0xec4   :  { %v1700_v48 = vpop.eup %1699 }
 0xec5   :  { %v1702_v49 = vpop.eup %1701  ;;  %940 = vrot.lane.b32.xlu1 %v1700_v48, %s1821_s12 }
 0xec6   :  { %942 = vrot.lane.b32.xlu0 %v1702_v49, %s1821_s12  ;;  %v1704_v11 = vpop.eup %1703 }
 0xec7   :  { %v1706_v14 = vpop.eup %1705  ;;  %v922_v50 = vadd.f32 1.0, %v1704_v11 }
 0xec8   :  { %v923_v51 = vadd.f32 1.0, %v1706_v14 }
 0xec9   :  { %1707 = vrcp.f32 %v922_v50 }
 0xeca   :  { %1709 = vrcp.f32 %v923_v51 }
 0xed3   :  { %v1708_v53 = vpop.eup %1707 }
 0xed4   :  { %v1710_v56 = vpop.eup %1709  ;;  %v936_v62 = vmul.f32 %v1708_v53, %v932_v60 }
 0xed5   :  { %v937_v63 = vmul.f32 %v1710_v56, %v933_v61 }
 0xf37   :  { %v941_v54 = vpop.permute.xlu1 %940 }
 0xf38   :  { %v943_v57 = vpop.permute.xlu0 %942  ;;  %v946_v58 = vmul.f32 %v1708_v53, %v941_v54 }
 0xf39   :  { %v947_v59 = vmul.f32 %v1710_v56, %v943_v57 }
 0xf3a   :  { %950 = vrot.lane.b32.xlu1 %v946_v58, %s1820_s4 }
 0xf3b   :  { %952 = vrot.lane.b32.xlu0 %v947_v59, %s1820_s4 }
 0xfac   :  { %v951_v0 = vpop.permute.xlu1 %950 }
 0xfad   :  { %v953_v1 = vpop.permute.xlu0 %952  ;;  %v956_v2 = vadd.f32 %v951_v0, %v936_v62 }
 0xfae   :  { %v957_v3 = vadd.f32 %v953_v1, %v937_v63 }
 0xfaf   :  { %1711 = vtanh.f32 %v956_v2  ;;  %v1072_v40 = vrot.slane %v956_v2, 7 }
 0xfb0   :  { %1713 = vtanh.f32 %v957_v3  ;;  %v1073_v41 = vrot.slane %v957_v3, 7 }
 0xfb9   :  { %v1712_v5 = vpop.eup %1711 }
 0xfba   :  { %v1714_v6 = vpop.eup %1713  ;;  %962 = vrot.lane.b32.xlu1 %v1712_v5, %s1821_s12 }
 0xfbb   :  { %964 = vrot.lane.b32.xlu0 %v1714_v6, %s1821_s12 }
0x102c   :  { %v963_v7 = vpop.permute.xlu1 %962 }
0x102d   :  { %v965_v9 = vpop.permute.xlu0 %964  ;;  %v968_v10 = vmul.f32 %v1708_v53, %v963_v7 }
0x102e   :  { %v969_v12 = vmul.f32 %v1710_v56, %v965_v9 }
0x102f   :  { %v972_v13 = vrot.slane %v968_v10, 5  ;;  %v1287_v15 = vsel %vm1286_vm8, %v1284_v37, %v968_v10 }
0x1030   :  { %v973_v16 = vrot.slane %v969_v12, 4  ;;  %v1288_v17 = vsel %vm1286_vm8, %v1285_v39, %v969_v12 }
0x1032   :  { %v974_v18 = vsel %vm275_vm3, %v973_v16, %v972_v13 }
0x1033   :  { %975 = vrot.lane.b32.xlu1 %v974_v18, %s1820_s4 }
0x10a5   :  { %v976_v19 = vpop.permute.xlu1 %975 }
0x10a6   :  { %1543 = vmatmul.mubr.msk.f32.vlgmr.msra.gmra.mrb[6].mxu1 %vm136_vm2, %v976_v19 }
0x1179   :  { %v1045_v52 = vpop.f32.mrb[6].mxu1 }
0x117a   :  { %v1050_v55 = vrot.slane %v1045_v52, 2  ;;  %v1051_v21 = vrot.slane %v1045_v52, 3  ;;  %v1544_v22 = vpop.f32.mrb[7].mxu1 }
0x117c   :  { %v1054_v23 = vadd.f32 %v1050_v55, %v1949_v24  ;;  %v1055_v25 = vadd.f32 %v1051_v21, %v1947_v20 }
0x117e   :  { %1715 = vtanh.f32 %v1054_v23  ;;  %v1410_v28 = vmul.f32 -1.442695, %v1054_v23  ;;  %v1411_v29 = vmul.f32 -1.442695, %v1055_v25 }
0x117f   :  { %1717 = vtanh.f32 %v1055_v25 }
0x1180   :  { %1719 = vpow2.f32 %v1410_v28 }
0x1181   :  { %1721 = vpow2.f32 %v1411_v29 }
0x1188   :  { %v1716_v26 = vpop.eup %1715 }
0x1189   :  { %v1718_v27 = vpop.eup %1717  ;;  %1080 = vrot.lane.b32.xlu0 %v1716_v26, %s1821_s12  ;;  %v1415_v26 = vld [vmem:[%s2139_s6] ss:$0 sm:$0xff]  ;;  %s1824_s6 = smov [#allocation5]  }
0x118a   :  { %1082 = vrot.lane.b32.xlu1 %v1718_v27, %s1821_s12  ;;  %v1720_v30 = vpop.eup %1719  ;;  %s1363_s15 = sshll.u32 %s1824_s6, 4  ;;  %s1364_s15 = int_to_ptr.vmem [resolvable:$true] %s1363_s15 }
0x118b   :  { %v1722_v31 = vpop.eup %1721  ;;  %v1062_v32 = vadd.f32 1.0, %v1720_v30  ;;  %s1747_s16 = scalar_lea.vmem %s1364_s15, 32  ;;  %p1752_p1 = scmp.lt.s32.totalorder %s1364_s15, %s1364_s15 }
0x118c   :  { %v1063_v33 = vadd.f32 1.0, %v1722_v31  ;;  %p1748_p0 = scmp.ne.s32.totalorder %s1364_s15, %s1747_s16  ;;  %p1753_p2 = scmp.lt.s32.totalorder %s1747_s16, %s1747_s16 }
0x118d   :  { %1723 = vrcp.f32 %v1062_v32 }
0x118e   :  { %1725 = vrcp.f32 %v1063_v33  ;;  %p1754_p3 = por %p1753_p2, %p1752_p1 }
0x1190   :  { %p1755_p4 = pnand %p1754_p3, %p1748_p0 }
0x1197   :  { %v1724_v34 = vpop.eup %1723 }
0x1198   :  { %v1726_v36 = vpop.eup %1725  ;;  %v1076_v42 = vmul.f32 %v1724_v34, %v1072_v40 }
0x1199   :  { %v1077_v43 = vmul.f32 %v1726_v36, %v1073_v41 }
0x11fb   :  { %v1081_v35 = vpop.permute.xlu0 %1080 }
0x11fc   :  { %v1083_v37 = vpop.permute.xlu1 %1082  ;;  %v1086_v38 = vmul.f32 %v1724_v34, %v1081_v35 }
0x11fd   :  { %v1087_v39 = vmul.f32 %v1726_v36, %v1083_v37  ;;  %v1823_v37 = vmov 0  }
0x11fe   :  { %1090 = vrot.lane.b32.xlu0 %v1086_v38, %s1820_s4 }
0x11ff   :  { %1092 = vrot.lane.b32.xlu1 %v1087_v39, %s1820_s4  ;;  %1618 = vset.pattern.permute.xlu0 %v1823_v37 }
0x1270   :  { %v1091_v44 = vpop.permute.xlu0 %1090 }
0x1271   :  { %v1093_v45 = vpop.permute.xlu1 %1092  ;;  %v1096_v46 = vadd.f32 %v1091_v44, %v1076_v42 }
0x1272   :  { %v1097_v47 = vadd.f32 %v1093_v45, %v1077_v43 }
0x1273   :  { %1727 = vtanh.f32 %v1096_v46  ;;  %v1212_v16 = vrot.slane %v1096_v46, 7  ;;  %v1416_v46 = vld [vmem:[#allocation2] ss:$0 sm:$0xff] }
0x1274   :  { %1729 = vtanh.f32 %v1097_v47 }
0x127d   :  { %v1728_v48 = vpop.eup %1727 }
0x127e   :  { %v1730_v49 = vpop.eup %1729  ;;  %1102 = vrot.lane.b32.xlu0 %v1728_v48, %s1821_s12 }
0x127f   :  { %1104 = vrot.lane.b32.xlu1 %v1730_v49, %s1821_s12 }
0x12f0   :  { %v1103_v8 = vpop.permute.xlu0 %1102 }
0x12f1   :  { %v1105_v4 = vpop.permute.xlu1 %1104  ;;  %v1108_v11 = vmul.f32 %v1724_v34, %v1103_v8 }
0x12f2   :  { %v1109_v14 = vmul.f32 %v1726_v36, %v1105_v4 }
0x12f3   :  { %v1112_v50 = vrot.slane %v1108_v11, 6  ;;  %v1290_v51 = vsel %vm1289_vm9, %v1287_v15, %v1108_v11 }
0x12f4   :  { %v1113_v53 = vrot.slane %v1109_v14, 5  ;;  %v1291_v54 = vsel %vm1289_vm9, %v1288_v17, %v1109_v14  ;;  %v1213_v17 = vrot.slane %v1097_v47, 7 }
0x12f6   :  { %v1114_v56 = vsel %vm275_vm3, %v1113_v53, %v1112_v50 }
0x12f7   :  { %1115 = vrot.lane.b32.xlu0 %v1114_v56, %s1820_s4 }
0x1369   :  { %v1116_v57 = vpop.permute.xlu0 %1115 }
0x136a   :  { %1554 = vmatmul.mubr.msk.f32.vlgmr.msra.gmra.mrb[8].mxu0 %vm136_vm2, %v1116_v57 }
0x143d   :  { %v1185_v58 = vpop.f32.mrb[8].mxu0 }
0x143e   :  { %v1190_v59 = vrot.slane %v1185_v58, 1  ;;  %v1191_v60 = vrot.slane %v1185_v58, 2  ;;  %v1555_v61 = vpop.f32.mrb[9].mxu0 }
0x1440   :  { %v1194_v62 = vadd.f32 %v1190_v59, %v1949_v24  ;;  %v1195_v63 = vadd.f32 %v1191_v60, %v1947_v20 }
0x1442   :  { %1731 = vtanh.f32 %v1194_v62  ;;  %v1413_v2 = vmul.f32 -1.442695, %v1194_v62  ;;  %v1414_v3 = vmul.f32 -1.442695, %v1195_v63 }
0x1443   :  { %1733 = vtanh.f32 %v1195_v63 }
0x1444   :  { %1735 = vpow2.f32 %v1413_v2 }
0x1445   :  { %1737 = vpow2.f32 %v1414_v3 }
0x144c   :  { %v1732_v0 = vpop.eup %1731 }
0x144d   :  { %v1734_v1 = vpop.eup %1733  ;;  %1220 = vrot.lane.b32.xlu1 %v1732_v0, %s1821_s12 }
0x144e   :  { %1222 = vrot.lane.b32.xlu0 %v1734_v1, %s1821_s12  ;;  %v1736_v5 = vpop.eup %1735 }
0x144f   :  { %v1738_v6 = vpop.eup %1737  ;;  %v1202_v7 = vadd.f32 1.0, %v1736_v5 }
0x1450   :  { %v1203_v9 = vadd.f32 1.0, %v1738_v6 }
0x1451   :  { %1739 = vrcp.f32 %v1202_v7 }
0x1452   :  { %1741 = vrcp.f32 %v1203_v9 }
0x145b   :  { %v1740_v24 = vpop.eup %1739 }
0x145c   :  { %v1742_v10 = vpop.eup %1741  ;;  %v1216_v18 = vmul.f32 %v1740_v24, %v1212_v16 }
0x145d   :  { %v1217_v19 = vmul.f32 %v1742_v10, %v1213_v17 }
0x14bf   :  { %v1221_v20 = vpop.permute.xlu1 %1220 }
0x14c0   :  { %v1223_v12 = vpop.permute.xlu0 %1222  ;;  %v1226_v13 = vmul.f32 %v1740_v24, %v1221_v20 }
0x14c1   :  { %v1227_v15 = vmul.f32 %v1742_v10, %v1223_v12 }
0x14c2   :  { %1230 = vrot.lane.b32.xlu1 %v1226_v13, %s1820_s4 }
0x14c3   :  { %1232 = vrot.lane.b32.xlu0 %v1227_v15, %s1820_s4 }
0x1534   :  { %v1231_v52 = vpop.permute.xlu1 %1230 }
0x1535   :  { %v1233_v55 = vpop.permute.xlu0 %1232  ;;  %v1236_v21 = vadd.f32 %v1231_v52, %v1216_v18 }
0x1536   :  { %v1237_v22 = vadd.f32 %v1233_v55, %v1217_v19 }
0x1537   :  { %1743 = vtanh.f32 %v1236_v21 }
0x1538   :  { %1745 = vtanh.f32 %v1237_v22  ;;  %v1265_v45 = vrot.slane %v1237_v22, 7 }
0x1541   :  { %v1744_v23 = vpop.eup %1743 }
0x1542   :  { %v1746_v25 = vpop.eup %1745  ;;  %1242 = vrot.lane.b32.xlu1 %v1744_v23, %s1821_s12 }
0x1543   :  { %1244 = vrot.lane.b32.xlu0 %v1746_v25, %s1821_s12 }
0x1546   :  { %1300 = vrot.lane.b32.xlu1 %v1415_v26, %s1822_s14 }
0x15b4   :  { %v1243_v27 = vpop.permute.xlu1 %1242 }
0x15b5   :  { %v1245_v28 = vpop.permute.xlu0 %1244  ;;  %v1248_v29 = vmul.f32 %v1740_v24, %v1243_v27 }
0x15b6   :  { %v1249_v30 = vmul.f32 %v1742_v10, %v1245_v28 }
0x15b7   :  { %v1293_v31 = vsel %vm1292_vm10, %v1290_v51, %v1248_v29 }
0x15b8   :  { %v1294_v32 = vsel %vm1292_vm10, %v1291_v54, %v1249_v30  ;;  %v1301_v33 = vpop.permute.xlu1 %1300  ;;  %v1252_v36 = vrot.slane %v1249_v30, 7 }
0x15b9   :  { %v1303_v34 = vmul.f32 %v1301_v33, %v1293_v31  ;;  %v1304_v35 = vmul.f32 %v1301_v33, %v1294_v32 }
0x15bb   :  { %1309 = vrot.lane.b32.xlu1 %v1304_v35, %s1820_s4  ;;  %1307 = vrot.lane.b32.xlu0 %v1303_v34, %s1820_s4 }
0x15bf   :  { %1253 = vrot.lane.b32.xlu1 %v1248_v29, %s1820_s4 }
0x15c3   :  { %1255 = vrot.lane.b32.xlu1 %v1252_v36, %s1820_s4 }
0x15c7   :  { %1266 = vrot.lane.b32.xlu1 %v1236_v21, %s1822_s14 }
0x162d   :  { %v1310_v38 = vpop.permute.xlu1 %1309  ;;  %v1308_v39 = vpop.permute.xlu0 %1307 }
0x162e   :  { %v1316_v40 = vsel %vm136_vm2, %v1310_v38, 0.0  ;;  %v1313_v41 = vsel %vm136_vm2, %v1308_v39, 0.0 }
0x162f   :  { %1317 = vadd.xlane.f32.xlu1 %v1316_v40  ;;  %1314 = vadd.xlane.f32.xlu0 %v1313_v41 }
0x1631   :  { %v1254_v42 = vpop.permute.xlu1 %1253 }
0x1632   :  { %1260 = vst.msk [vmem:[#allocation5 - $0x7] sm:$0x80] %vm1259_vm11, %v1254_v42 }
0x1635   :  { %v1256_v43 = vpop.permute.xlu1 %1255 }
0x1636   :  { %1262 = vst.msk [vmem:[#allocation5 + $0x1] sm:$0x1] %vm1261_vm12, %v1256_v43 }
0x1639   :  { %v1267_v44 = vpop.permute.xlu1 %1266 }
0x163a   :  { %1272 = vst.msk [vmem:[#allocation7 - $0x7] sm:$0x80] %vm1259_vm11, %v1267_v44 }
0x1640   :  { %1268 = vrot.lane.b32.xlu1 %v1265_v45, %s1822_s14 }
0x1645   :  { %1326 = vperm.xlu0 %1618, %v1416_v46  }
0x1646   :  { %1758 = shalt.err (!%p1755_p4)
}
0x1647   :  { %s1759_s19 = scalar_lea.hbm %s2142_s9, 32 }
0x1648   :  { %p1760_p5 = scmp.ne.s32.totalorder %s2142_s9, %s1759_s19  ;;  %p1763_p6 = scmp.lt.u32.totalorder %s1759_s19, %s2142_s9 }
0x164a   :  { %p1765_p7 = pnand %p1763_p6, %p1760_p5 }
0x164c   :  { %1768 = shalt.err (!%p1765_p7)
}
0x164d   :  { %1366 = dma.vmem_to_hbm [thread:$0]  %s1364_s15, 32, %s2142_s9, [#allocation6]   ;;  %v1333_v47 = vlaneseq }
0x164e   :  { %s1825_s24 = smov [#allocation7]  }
0x164f   :  { %s1373_s25 = sshll.u32 %s1825_s24, 4  ;;  %v1334_v49 = vand.u32 127, %v1333_v47  ;;  %v1336_v8 = vshrl.u32 %v1333_v47, 7  ;;  %s1374_s25 = int_to_ptr.vmem [resolvable:$true] %s1373_s25 }
0x1650   :  { %s1769_s26 = scalar_lea.vmem %s1374_s25, 32  ;;  %p1774_p9 = scmp.lt.s32.totalorder %s1374_s25, %s1374_s25 }
0x1651   :  { %p1770_p8 = scmp.ne.s32.totalorder %s1374_s25, %s1769_s26  ;;  %p1775_p10 = scmp.lt.s32.totalorder %s1769_s26, %s1769_s26 }
0x1653   :  { %p1776_p11 = por %p1775_p10, %p1774_p9 }
0x1655   :  { %p1777_p12 = pnand %p1776_p11, %p1770_p8 }
0x16bc   :  { %v1318_v48 = vpop.xlane.xlu1 %1317  ;;  %v1315_v4 = vpop.xlane.xlu0 %1314 }
0x16c0   :  { %v1269_v11 = vpop.permute.xlu1 %1268 }
0x16c1   :  { %1273 = vst.msk [vmem:[#allocation7 + $0x1] sm:$0x1] %vm1261_vm12, %v1269_v11 }
0x16c2   :  { %1780 = shalt.err (!%p1777_p12)
}
0x16c3   :  { %s1781_s28 = scalar_lea.hbm %s2143_s10, 32 }
0x16c4   :  { %p1782_p13 = scmp.ne.s32.totalorder %s2143_s10, %s1781_s28  ;;  %p1785_p0 = scmp.lt.u32.totalorder %s1781_s28, %s2143_s10 }
0x16c6   :  { %p1787_p1 = pnand %p1785_p0, %p1782_p13 }
0x16c8   :  { %1790 = shalt.err (!%p1787_p1)
}
0x16c9   :  { %1376 = dma.vmem_to_hbm [thread:$0]  %s1374_s25, 32, %s2143_s10, [#allocation6]   ;;  %v1337_v14 = vsub.s32 %v1334_v49, %v1336_v8  ;;  %v1327_v50 = vpop.permute.xlu0 %1326  ;;  %vm1345_vm13 = vcmask 58368  }
0x16ca   :  { %v1329_v51 = vadd.f32 %v1327_v50, %v1315_v4  ;;  %v1330_v53 = vadd.f32 %v1327_v50, %v1318_v48  ;;  %s1826_s1 = smov [#allocation3]  }
0x16cb   :  { %s1353_s12 = sshll.u32 %s1826_s1, 4  ;;  %s1354_s12 = int_to_ptr.vmem [resolvable:$true] %s1353_s12 }
0x16cc   :  { %v1338_v54 = vrot.slane %v1329_v51, %v1337_v14  ;;  %v1342_v56 = vrot.slane %v1330_v53, %v1337_v14  ;;  %s1791_s5 = scalar_lea.vmem %s1354_s12, 32  ;;  %p1796_p3 = scmp.lt.s32.totalorder %s1354_s12, %s1354_s12 }
0x16cd   :  { %p1792_p2 = scmp.ne.s32.totalorder %s1354_s12, %s1791_s5  ;;  %p1797_p4 = scmp.lt.s32.totalorder %s1791_s5, %s1791_s5 }
0x16ce   :  { %v1343_v57 = vsel %vm275_vm3, %v1342_v56, %v1338_v54 }
0x16cf   :  { %1346 = vst.msk [vmem:[#allocation3] sm:$0x3] %vm1345_vm13, %v1343_v57  ;;  %p1798_p5 = por %p1797_p4, %p1796_p3 }
0x16d1   :  { %p1799_p6 = pnand %p1798_p5, %p1792_p2 }
0x16d3   :  { %1802 = shalt.err (!%p1799_p6)
}
0x16d4   :  { %s1803_s14 = scalar_lea.hbm %s2141_s8, 32 }
0x16d5   :  { %p1804_p7 = scmp.ne.s32.totalorder %s2141_s8, %s1803_s14  ;;  %p1807_p8 = scmp.lt.u32.totalorder %s1803_s14, %s2141_s8 }
0x16d7   :  { %p1809_p9 = pnand %p1807_p8, %p1804_p7 }
0x16d9   :  { %1812 = shalt.err (!%p1809_p9)
}
0x16da   :  { %1356 = dma.vmem_to_hbm [thread:$0]  %s1354_s12, 32, %s2141_s8, [#allocation4]  }
0x16db   :  { %1813 = dma.done.wait [#allocation4], 32  }
0x16dc   :  { %1814 = vsyncadd [#allocation4], 4294967264 }
0x16dd   :  { %1815 = dma.done.wait [#allocation6], 64  }
0x16de   :  { %1816 = vsyncadd [#allocation6], 4294967232 }
0x16df   :  { %1386 = vsyncpa [#allocation4], 1 }
0x16e0   :  { %1387 = vsyncpa [#allocation6], 1 }

</bundles_post_ra>
